<compile_context>
chip_gen: v7x
topology: tpu7x:2x2x1
jax: 0.10.0
libtpu: 0.0.40
codegen_flags: <defaults>
</compile_context>

<pallas_src>
import functools

import jax
import jax.numpy as jnp
from jax.experimental import pallas as pl
from jax.experimental.pallas import tpu as pltpu

_NBUF = 2  # Pallas default double-buffering per pipelined block.


def _round_up(x, m):
    return ((x + m - 1) // m) * m


def _vmem_capacity_bytes():
    try:
        return int(pltpu.get_tpu_info().vmem_capacity_bytes)
    except Exception:
        return 64 * 2**20  # conservative (v7x-sized) fallback


def _activate(v, activation):
    if activation == "relu":
        return jnp.maximum(v, 0.0)
    # PyTorch nn.GELU() default = exact erf formulation.
    return 0.5 * v * (1.0 + jax.lax.erf(v * 0.7071067811865476))


# ----------------------------------------------------------------------------
# Kernel
# ----------------------------------------------------------------------------
def mlp_block_kernel(x_ref, w1_ref, b1_ref, w2_ref, b2_ref, o_ref, acc_ref,
                     *, activation):
    k = pl.program_id(1)

    @pl.when(k == 0)
    def _():
        acc_ref[...] = jnp.zeros_like(acc_ref)

    # First linear (this hidden tile only) + activation, accumulated in f32.
    h = jnp.dot(x_ref[...], w1_ref[...], preferred_element_type=jnp.float32)
    h = _activate(h + b1_ref[...], activation)           # (TB, tk) + (1, tk)

    # Second linear: accumulate this hidden tile's contribution in f32.
    acc_ref[...] += jnp.dot(h.astype(w2_ref.dtype), w2_ref[...],
                            preferred_element_type=jnp.float32)

    @pl.when(k == pl.num_programs(1) - 1)
    def _():
        y = _activate(acc_ref[...] + b2_ref[...], activation)
        o_ref[...] = y.astype(o_ref.dtype)


# ----------------------------------------------------------------------------
# Parameter preparation (hoist out of the hot path)
# ----------------------------------------------------------------------------
def _pad2d(a, rows, cols, dtype):
    """Zero-pad a 2-D array to (rows, cols) and cast; no-op when already there."""
    if a.shape == (rows, cols):
        return a if a.dtype == dtype else a.astype(dtype)
    return jnp.zeros((rows, cols), dtype).at[:a.shape[0], :a.shape[1]].set(
        a.astype(dtype))


def _pad_bias(b, cols):
    return _pad2d(b.reshape(1, -1), 1, cols, jnp.float32)


def prepare_mlp_weights(w1, b1, w2, b2, *, compute_dtype=jnp.bfloat16):
    """Pad feature dims to multiples of 128 and cast to the MXU feed dtype.

    Call ONCE per weight set, outside the per-step hot path, so the padded /
    cast copies of W1/W2 are not re-materialized on every forward call.
    Use compute_dtype=jnp.float32 for exact float32 semantics.
    """
    in_f, hdim = w1.shape
    out_f = w2.shape[1]
    in_p, hid_p, out_p = (_round_up(d, 128) for d in (in_f, hdim, out_f))
    w1p = _pad2d(w1, in_p, hid_p, compute_dtype)
    w2p = _pad2d(w2, hid_p, out_p, compute_dtype)
    b1p = _pad_bias(b1, hid_p)
    b2p = _pad_bias(b2, out_p)
    return (w1p, b1p, w2p, b2p, in_f, hdim, out_f, jnp.dtype(compute_dtype))


# ----------------------------------------------------------------------------
# Tile / VMEM-budget selection
# ----------------------------------------------------------------------------
def _choose_tiles(b_p, in_p, hid_p, out_p, cbytes, obytes):
    vmem_cap = _vmem_capacity_bytes()
    budget = int(vmem_cap * 0.75)     # leave headroom for compiler scratch
    usable = int(budget * 0.85)       # design tiles against this

    def per_row_bytes():
        # x block + out block (double buffered) + f32 accumulator, per row.
        return _NBUF * in_p * cbytes + _NBUF * out_p * obytes + out_p * 4

    def weights_bytes(tk):
        # Double-buffered W1/W2 tiles + f32 bias tiles.
        return _NBUF * ((in_p * tk + tk * out_p) * cbytes + (tk + out_p) * 4)

    # --- Regime A: weights fully VMEM-resident (tile_k = hid_p, n_k == 1). ---
    if weights_bytes(hid_p) <= budget * 0.55:
        tile_k = hid_p
        room = usable - weights_bytes(hid_p)
        tile_b = max(8, min(1024, b_p, (room // per_row_bytes()) // 8 * 8))
        # Megacore (v7x): make sure both TensorCores get a batch tile.
        # Intensity is weight-fetch independent here, so splitting is free.
        if tile_b >= b_p and b_p >= 16:
            tile_b = _round_up(pl.cdiv(b_p, 2), 8)
        return tile_b, tile_k, True, budget

    # --- Regime B: stream hidden-dim tiles; tile_b is the intensity knob. ---
    best = (8, 128)
    for tk in (512, 384, 256, 128):
        if tk > hid_p or hid_p % tk != 0:
            continue
        room = usable - weights_bytes(tk)
        tb = max(0, room) // per_row_bytes() // 8 * 8
        if tb > best[0]:
            best = (tb, tk)
        if tb >= min(b_p, 512):       # largest tile_k that still allows target tile_b
            best = (tb, tk)
            break
    tb, tile_k = best
    tile_b = max(8, min(1024, b_p, tb))
    # Only split for megacore if each half keeps good flops/weight-byte ratio.
    if tile_b >= b_p and b_p >= 1024:
        tile_b = _round_up(pl.cdiv(b_p, 2), 8)
    return tile_b, tile_k, False, budget


# ----------------------------------------------------------------------------
# Forward pass
# ----------------------------------------------------------------------------
def mlp_block_prepared(x, params, *, activation="relu"):
    """x: [B, in_f]; params from prepare_mlp_weights()."""
    w1p, b1p, w2p, b2p, in_f, hdim, out_f, compute_dtype = params
    B = x.shape[0]
    assert x.shape[1] == in_f, "x feature dim mismatch"
    out_dtype = x.dtype

    in_p, hid_p = w1p.shape
    out_p = w2p.shape[1]
    cbytes = jnp.dtype(compute_dtype).itemsize
    obytes = jnp.dtype(out_dtype).itemsize

    b_p = _round_up(B, 8)
    xp = _pad2d(x, b_p, in_p, compute_dtype)   # no-op if already aligned/cast

    tile_b, tile_k, resident, vmem_limit = _choose_tiles(
        b_p, in_p, hid_p, out_p, cbytes, obytes)
    n_b = pl.cdiv(b_p, tile_b)                 # last batch tile may be ragged
    n_k = hid_p // tile_k                      # tile_k always divides hid_p
    grid = (n_b, n_k)

    # Advisory cost estimate for the XLA scheduler.
    rows_computed = n_b * tile_b
    flops = 2 * rows_computed * (in_p * hid_p + hid_p * out_p)
    transcendentals = 0 if activation == "relu" else rows_computed * (hid_p + out_p)
    weight_fetches = 1 if resident else n_b    # constant block idx -> single DMA
    bytes_accessed = (b_p * in_p * cbytes
                      + weight_fetches * ((in_p * hid_p + hid_p * out_p) * cbytes
                                          + (hid_p + out_p) * 4)
                      + b_p * out_p * obytes)

    kernel = functools.partial(mlp_block_kernel, activation=activation)

    out_padded = pl.pallas_call(
        kernel,
        out_shape=jax.ShapeDtypeStruct((b_p, out_p), out_dtype),
        grid_spec=pltpu.PrefetchScalarGridSpec(
            num_scalar_prefetch=0,
            grid=grid,
            in_specs=[
                pl.BlockSpec((tile_b, in_p), lambda i, k: (i, 0)),   # x tile
                pl.BlockSpec((in_p, tile_k), lambda i, k: (0, k)),   # W1 col tile
                pl.BlockSpec((1, tile_k), lambda i, k: (0, k)),      # b1 tile
                pl.BlockSpec((tile_k, out_p), lambda i, k: (k, 0)),  # W2 row tile
                pl.BlockSpec((1, out_p), lambda i, k: (0, 0)),       # b2
            ],
            out_specs=pl.BlockSpec((tile_b, out_p), lambda i, k: (i, 0)),
            scratch_shapes=[pltpu.VMEM((tile_b, out_p), jnp.float32)],
        ),
        compiler_params=pltpu.CompilerParams(
            dimension_semantics=("parallel", "arbitrary"),
            vmem_limit_bytes=int(vmem_limit)),
        cost_estimate=pl.CostEstimate(flops=int(flops),
                                      transcendentals=int(transcendentals),
                                      bytes_accessed=int(bytes_accessed)),
    )(xp, w1p, b1p, w2p, b2p)

    return out_padded[:B, :out_f]


def mlp_block(x, w1, b1, w2, b2, *, activation="relu",
              compute_dtype=jnp.bfloat16):
    """Convenience wrapper. Prefer prepare_mlp_weights() + mlp_block_prepared()
    so the weight pad/cast happens once, outside the hot path."""
    params = prepare_mlp_weights(w1, b1, w2, b2, compute_dtype=compute_dtype)
    return mlp_block_prepared(x, params, activation=activation)


# ----------------------------------------------------------------------------
# Pure-JAX references
# ----------------------------------------------------------------------------
def mlp_block_ref_mixed(x, w1, b1, w2, b2, activation="relu",
                        compute_dtype=jnp.bfloat16):
    """Reference mirroring the kernel's bf16-feed / f32-accumulate recipe."""
    h = jnp.dot(x.astype(compute_dtype), w1.astype(compute_dtype),
                preferred_element_type=jnp.float32)
    h = _activate(h + b1.astype(jnp.float32), activation)
    y = jnp.dot(h.astype(compute_dtype), w2.astype(compute_dtype),
                preferred_element_type=jnp.float32)
    y = _activate(y + b2.astype(jnp.float32), activation)
    return y.astype(x.dtype)


def mlp_block_ref_f32(x, w1, b1, w2, b2, activation="relu"):
    h = _activate(x @ w1 + b1, activation)
    return _activate(h @ w2 + b2, activation)


if __name__ == "__main__":
    # Small shapes consistent with MLPBlock(in_features=32, hdim=64, out_features=32).
    B, IN_F, HDIM, OUT_F = 8, 32, 64, 32

    key = jax.random.PRNGKey(0)
    kx, kw1, kb1, kw2, kb2 = jax.random.split(key, 5)

    x = jax.random.normal(kx, (B, IN_F), dtype=jnp.float32)
    bound1 = 1.0 / IN_F ** 0.5
    w1 = jax.random.uniform(kw1, (IN_F, HDIM), jnp.float32, -bound1, bound1)
    b1 = jax.random.uniform(kb1, (HDIM,), jnp.float32, -bound1, bound1)
    bound2 = 1.0 / HDIM ** 0.5
    w2 = jax.random.uniform(kw2, (HDIM, OUT_F), jnp.float32, -bound2, bound2)
    b2 = jax.random.uniform(kb2, (OUT_F,), jnp.float32, -bound2, bound2)

    # Prepare (pad + cast) the weights once, outside the hot path.
    params = prepare_mlp_weights(w1, b1, w2, b2, compute_dtype=jnp.bfloat16)
    out = jax.block_until_ready(mlp_block_prepared(x, params, activation="relu"))
    assert out.shape == (B, OUT_F)

    # Matches a reference using the same bf16-feed / f32-accumulate recipe.
    ref_mixed = mlp_block_ref_mixed(x, w1, b1, w2, b2)
    assert jnp.allclose(out, ref_mixed, atol=1e-3, rtol=1e-3), \
        "mismatch vs mixed-precision reference"

    # And stays close to pure-f32 PyTorch semantics (use compute_dtype=float32
    # via prepare_mlp_weights for exact f32 behaviour).
    ref_f32 = mlp_block_ref_f32(x, w1, b1, w2, b2)
    assert jnp.allclose(out, ref_f32, atol=5e-2, rtol=5e-2), \
        "mismatch vs f32 reference"

    print("KERNEL_OK")
</pallas_src>

<mosaic_0001>
module attributes {stable_mosaic.version = 11 : i64} {
  func.func @mlp_block_kernel(%arg0: i32, %arg1: i32, %arg2: memref<8x128xbf16, #tpu.memory_space<vmem>>, %arg3: memref<128x128xbf16, #tpu.memory_space<vmem>>, %arg4: memref<1x128xf32, #tpu.memory_space<vmem>>, %arg5: memref<128x128xbf16, #tpu.memory_space<vmem>>, %arg6: memref<1x128xf32, #tpu.memory_space<vmem>>, %arg7: memref<8x128xf32, #tpu.memory_space<vmem>>, %arg8: memref<8x128xf32, #tpu.memory_space<vmem>>) attributes {dimension_semantics = [#tpu.dimension_semantics<parallel>, #tpu.dimension_semantics<arbitrary>], iteration_bounds = array<i64: 1, 1>, scalar_prefetch = 0 : i64, scratch_operands = 1 : i64, tpu.core_type = #tpu.core_type<tc>, window_params = [{transform_indices = @transform_0, window_bounds = array<i64: 8, 128>}, {transform_indices = @transform_1, window_bounds = array<i64: 128, 128>}, {transform_indices = @transform_2, window_bounds = array<i64: 1, 128>}, {transform_indices = @transform_3, window_bounds = array<i64: 128, 128>}, {pipeline_mode = #tpu.pipeline_mode<synchronous>, transform_indices = @transform_4, window_bounds = array<i64: 1, 128>}, {transform_indices = @transform_5, window_bounds = array<i64: 8, 128>}]} {
    %c0_i32 = arith.constant 0 : i32
    %0 = arith.cmpi eq, %arg1, %c0_i32 : i32
    %1 = arith.extui %0 : i1 to i32
    %c0_i32_0 = arith.constant 0 : i32
    %2 = arith.cmpi ne, %1, %c0_i32_0 : i32
    scf.if %2 {
      %cst_16 = arith.constant 0.000000e+00 : f32
      %20 = vector.broadcast %cst_16 : f32 to vector<8x128xf32>
      %c0_17 = arith.constant 0 : index
      %c0_18 = arith.constant 0 : index
      %21 = vector.load %arg8[%c0_17, %c0_18] : memref<8x128xf32, #tpu.memory_space<vmem>>, vector<8x128xf32>
      tpu.vector_store %arg8[%c0_17, %c0_18], %20 {strides = array<i32>} : memref<8x128xf32, #tpu.memory_space<vmem>>, vector<8x128xf32>,
    } else {
    }
    %c0 = arith.constant 0 : index
    %c0_1 = arith.constant 0 : index
    %3 = vector.load %arg2[%c0, %c0_1] : memref<8x128xbf16, #tpu.memory_space<vmem>>, vector<8x128xbf16>
    %c0_2 = arith.constant 0 : index
    %c0_3 = arith.constant 0 : index
    %4 = vector.load %arg3[%c0_2, %c0_3] : memref<128x128xbf16, #tpu.memory_space<vmem>>, vector<128x128xbf16>
    %cst = arith.constant dense<0.000000e+00> : vector<8x128xf32>
    %5 = tpu.matmul %3, %4, %cst {dimension_numbers = #tpu.dot_dimension_numbers<[1], [0], [0], [1], [0, 0, 1, 1], [], []>} : vector<8x128xbf16>, vector<128x128xbf16>, vector<8x128xf32> -> vector<8x128xf32>
    %c0_4 = arith.constant 0 : index
    %c0_5 = arith.constant 0 : index
    %6 = vector.load %arg4[%c0_4, %c0_5] : memref<1x128xf32, #tpu.memory_space<vmem>>, vector<1x128xf32>
    %7 = vector.broadcast %6 : vector<1x128xf32> to vector<8x128xf32>
    %8 = arith.addf %5, %7 : vector<8x128xf32>
    %cst_6 = arith.constant 0.000000e+00 : f32
    %9 = vector.broadcast %cst_6 : f32 to vector<8x128xf32>
    %10 = arith.maximumf %8, %9 : vector<8x128xf32>
    %c0_7 = arith.constant 0 : index
    %c0_8 = arith.constant 0 : index
    %11 = vector.load %arg8[%c0_7, %c0_8] : memref<8x128xf32, #tpu.memory_space<vmem>>, vector<8x128xf32>
    %12 = arith.truncf %10 : vector<8x128xf32> to vector<8x128xbf16>
    %c0_9 = arith.constant 0 : index
    %c0_10 = arith.constant 0 : index
    %13 = vector.load %arg5[%c0_9, %c0_10] : memref<128x128xbf16, #tpu.memory_space<vmem>>, vector<128x128xbf16>
    %cst_11 = arith.constant dense<0.000000e+00> : vector<8x128xf32>
    %14 = tpu.matmul %12, %13, %cst_11 {dimension_numbers = #tpu.dot_dimension_numbers<[1], [0], [0], [1], [0, 0, 1, 1], [], []>} : vector<8x128xbf16>, vector<128x128xbf16>, vector<8x128xf32> -> vector<8x128xf32>
    %15 = arith.addf %11, %14 : vector<8x128xf32>
    %c0_12 = arith.constant 0 : index
    %c0_13 = arith.constant 0 : index
    %16 = vector.load %arg8[%c0_12, %c0_13] : memref<8x128xf32, #tpu.memory_space<vmem>>, vector<8x128xf32>
    tpu.vector_store %arg8[%c0_12, %c0_13], %15 {strides = array<i32>} : memref<8x128xf32, #tpu.memory_space<vmem>>, vector<8x128xf32>,
    %c0_i32_14 = arith.constant 0 : i32
    %17 = arith.cmpi eq, %arg1, %c0_i32_14 : i32
    %18 = arith.extui %17 : i1 to i32
    %c0_i32_15 = arith.constant 0 : i32
    %19 = arith.cmpi ne, %18, %c0_i32_15 : i32
    scf.if %19 {
      %c0_16 = arith.constant 0 : index
      %c0_17 = arith.constant 0 : index
      %20 = vector.load %arg8[%c0_16, %c0_17] : memref<8x128xf32, #tpu.memory_space<vmem>>, vector<8x128xf32>
      %c0_18 = arith.constant 0 : index
      %c0_19 = arith.constant 0 : index
      %21 = vector.load %arg6[%c0_18, %c0_19] : memref<1x128xf32, #tpu.memory_space<vmem>>, vector<1x128xf32>
      %22 = vector.broadcast %21 : vector<1x128xf32> to vector<8x128xf32>
      %23 = arith.addf %20, %22 : vector<8x128xf32>
      %cst_20 = arith.constant 0.000000e+00 : f32
      %24 = vector.broadcast %cst_20 : f32 to vector<8x128xf32>
      %25 = arith.maximumf %23, %24 : vector<8x128xf32>
      %c0_21 = arith.constant 0 : index
      %c0_22 = arith.constant 0 : index
      %26 = vector.load %arg7[%c0_21, %c0_22] : memref<8x128xf32, #tpu.memory_space<vmem>>, vector<8x128xf32>
      tpu.vector_store %arg7[%c0_21, %c0_22], %25 {strides = array<i32>} : memref<8x128xf32, #tpu.memory_space<vmem>>, vector<8x128xf32>,
    } else {
    }
    return
  }
  func.func @transform_0(%arg0: i32, %arg1: i32) -> (i32, i32) {
    %c0_i32 = arith.constant 0 : i32
    %c0_i32_0 = arith.constant 0 : i32
    return %arg0, %c0_i32 : i32, i32
  }
  func.func @transform_1(%arg0: i32, %arg1: i32) -> (i32, i32) {
    %c0_i32 = arith.constant 0 : i32
    %c0_i32_0 = arith.constant 0 : i32
    return %c0_i32, %arg1 : i32, i32
  }
  func.func @transform_2(%arg0: i32, %arg1: i32) -> (i32, i32) {
    %c0_i32 = arith.constant 0 : i32
    %c0_i32_0 = arith.constant 0 : i32
    return %c0_i32, %arg1 : i32, i32
  }
  func.func @transform_3(%arg0: i32, %arg1: i32) -> (i32, i32) {
    %c0_i32 = arith.constant 0 : i32
    %c0_i32_0 = arith.constant 0 : i32
    return %arg1, %c0_i32 : i32, i32
  }
  func.func @transform_4(%arg0: i32, %arg1: i32) -> (i32, i32) {
    %c0_i32 = arith.constant 0 : i32
    %c0_i32_0 = arith.constant 0 : i32
    %c0_i32_1 = arith.constant 0 : i32
    return %c0_i32, %c0_i32_0 : i32, i32
  }
  func.func @transform_5(%arg0: i32, %arg1: i32) -> (i32, i32) {
    %c0_i32 = arith.constant 0 : i32
    %c0_i32_0 = arith.constant 0 : i32
    return %arg0, %c0_i32 : i32, i32
  }
}

</mosaic_0001>

<bundles_post_ra>
// kernel: tpu_custom_call.1
= control target key start
LH: loop header
LB: loop body
LE: loop exit
PB: predicated region body
PF: predicated region fallthrough
CT: control target
= control target key end

     0   :  { %10 = vsyncpa [#allocation4], 0  ;;  %s609_s0 = inlined_call_operand.hbm [shape: bf16[8,128], index: 0, kind: input, shape index: {}]   ;;  %s610_s1 = inlined_call_operand.hbm [shape: bf16[128,128], index: 1, kind: input, shape index: {}]   ;;  %s611_s2 = inlined_call_operand.vmem [shape: f32[1,128], index: 2, kind: input, shape index: {}]   ;;  %s612_s3 = inlined_call_operand.hbm [shape: bf16[128,128], index: 3, kind: input, shape index: {}]   ;;  %s613_s4 = inlined_call_operand.vmem [shape: f32[1,128], index: 4, kind: input, shape index: {}]   ;;  %s614_s5 = inlined_call_operand.hbm [shape: f32[8,128], index: 5, kind: output, shape index: {}]  }
   0x1   :  { %11 = vsyncpa [#allocation7], 0 }
   0x2   :  { %12 = vsyncpa [#allocation5], 0  ;;  %s511_s18 = smov [#allocation6]   ;;  %s417_s22 = scalar_lea.hbm %s610_s1, 1024 }
   0x3   :  { %s28_s19 = sshll.u32 %s511_s18, 4  ;;  %p418_p0 = scmp.ne.s32.totalorder %s610_s1, %s417_s22  ;;  %s29_s19 = int_to_ptr.vmem [resolvable:$true] %s28_s19 }
   0x4   :  { %p421_p1 = scmp.lt.u32.totalorder %s417_s22, %s610_s1 }
   0x6   :  { %p423_p2 = pnand %p421_p1, %p418_p0 }
   0x8   :  { %426 = shalt.err (!%p423_p2)
}
   0x9   :  { %s427_s27 = scalar_lea.vmem %s29_s19, 1024  ;;  %p432_p4 = scmp.lt.s32.totalorder %s29_s19, %s29_s19 }
   0xa   :  { %p428_p3 = scmp.ne.s32.totalorder %s29_s19, %s427_s27  ;;  %p433_p5 = scmp.lt.s32.totalorder %s427_s27, %s427_s27 }
   0xc   :  { %p434_p6 = por %p433_p5, %p432_p4 }
   0xe   :  { %p435_p7 = pnand %p434_p6, %p428_p3 }
  0x10   :  { %438 = shalt.err (!%p435_p7)
}
  0x11   :  { %s512_s28 = smov 64   ;;  %s513_s29 = smov 4  }
  0x12   :  { %34 = dma.hbm_to_vmem [thread:$0]  %s610_s1, 1024, %s29_s19, [#allocation7], %s512_s28, %s512_s28, %s513_s29  }
  0x13   :  { %s514_s7 = smov [#allocation3]   ;;  %s515_s9 = smov [#allocation8]  }
  0x14   :  { %s19_s8 = sshll.u32 %s514_s7, 4  ;;  %s42_s10 = sshll.u32 %s515_s9, 4  ;;  %s20_s8 = int_to_ptr.vmem [resolvable:$true] %s19_s8  ;;  %s43_s10 = int_to_ptr.vmem [resolvable:$true] %s42_s10 }
  0x15   :  { %s439_s13 = scalar_lea.hbm %s609_s0, 64 }
  0x16   :  { %p440_p8 = scmp.ne.s32.totalorder %s609_s0, %s439_s13  ;;  %p443_p9 = scmp.lt.u32.totalorder %s439_s13, %s609_s0 }
  0x18   :  { %p445_p10 = pnand %p443_p9, %p440_p8 }
  0x1a   :  { %448 = shalt.err (!%p445_p10)
}
  0x1b   :  { %s449_s1 = scalar_lea.vmem %s20_s8, 64  ;;  %p454_p12 = scmp.lt.s32.totalorder %s20_s8, %s20_s8 }
  0x1c   :  { %p450_p11 = scmp.ne.s32.totalorder %s20_s8, %s449_s1  ;;  %p455_p13 = scmp.lt.s32.totalorder %s449_s1, %s449_s1 }
  0x1e   :  { %p456_p0 = por %p455_p13, %p454_p12 }
  0x20   :  { %p457_p1 = pnand %p456_p0, %p450_p11 }
  0x22   :  { %460 = shalt.err (!%p457_p1)
}
  0x23   :  { %22 = dma.hbm_to_vmem [thread:$0]  %s609_s0, 64, %s20_s8, [#allocation4]  }
  0x24   :  { %s461_s22 = scalar_lea.hbm %s612_s3, 1024 }
  0x25   :  { %p462_p2 = scmp.ne.s32.totalorder %s612_s3, %s461_s22  ;;  %p465_p3 = scmp.lt.u32.totalorder %s461_s22, %s612_s3 }
  0x27   :  { %p467_p4 = pnand %p465_p3, %p462_p2 }
  0x29   :  { %470 = shalt.err (!%p467_p4)
}
  0x2a   :  { %s471_s27 = scalar_lea.vmem %s43_s10, 1024  ;;  %p476_p6 = scmp.lt.s32.totalorder %s43_s10, %s43_s10 }
  0x2b   :  { %p472_p5 = scmp.ne.s32.totalorder %s43_s10, %s471_s27  ;;  %p477_p7 = scmp.lt.s32.totalorder %s471_s27, %s471_s27 }
  0x2d   :  { %p478_p8 = por %p477_p7, %p476_p6 }
  0x2f   :  { %p479_p9 = pnand %p478_p8, %p472_p5 }
  0x31   :  { %482 = shalt.err (!%p479_p9)
}
  0x32   :  { %48 = dma.hbm_to_vmem [thread:$0]  %s612_s3, 1024, %s43_s10, [#allocation7], %s512_s28, %s512_s28, %s513_s29  }
  0x33   :  { %505 = dma.done.wait [#allocation4], 64  }
  0x34   :  { %506 = vsyncadd [#allocation4], 4294967232 }
  0x35   :  { %507 = dma.done.wait [#allocation7], 2048  }
  0x36   :  { %508 = vsyncadd [#allocation7], 4294965248  ;;  %v516_v0 = vmov 0.0   ;;  %vm517_vm0 = vmmov 0   ;;  %v401_v1 = vld [vmem:[#allocation6] sm:$0xff]   ;;  %v402_v2 = vld [vmem:[#allocation6 + $0x8] sm:$0xff]  }
  0x37   :  { %353 = vmatprep.subr.bf16.mxu0 %v516_v0  ;;  %369 = vmatprep.mubr.msk.bf16.mxu0 %vm517_vm0, %v516_v0  ;;  %v403_v3 = vld [vmem:[#allocation6 + $0x10] sm:$0xff]   ;;  %v409_v4 = vld [vmem:[#allocation8] sm:$0xff]   ;;  %v404_v5 = vld [vmem:[#allocation6 + $0x18] sm:$0xff]   ;;  %s518_s7 = smov [#allocation9]  }
  0x38   :  { %373 = vmatprep.subr.bf16.mxu1 %v516_v0  ;;  %389 = vmatprep.mubr.msk.bf16.mxu1 %vm517_vm0, %v516_v0  ;;  %v410_v6 = vld [vmem:[#allocation8 + $0x8] sm:$0xff]   ;;  %v405_v7 = vld [vmem:[#allocation6 + $0x20] sm:$0xff]   ;;  %v411_v8 = vld [vmem:[#allocation8 + $0x10] sm:$0xff]   ;;  %s307_s8 = sshll.u32 %s518_s7, 4  ;;  %s308_s8 = int_to_ptr.vmem [resolvable:$true] %s307_s8 }
  0x39   :  { %354 = vmatpush3.bf16.msra.mxu0 %v401_v1  ;;  %374 = vmatpush3.bf16.msra.mxu1 %v409_v4  ;;  %v406_v9 = vld [vmem:[#allocation6 + $0x28] sm:$0xff]   ;;  %v412_v10 = vld [vmem:[#allocation8 + $0x18] sm:$0xff]   ;;  %v407_v11 = vld [vmem:[#allocation6 + $0x30] sm:$0xff]   ;;  %p488_p11 = scmp.lt.s32.totalorder %s308_s8, %s308_s8 }
  0x3a   :  { %355 = vmatprep.subr.bf16.mxu0 %v516_v0  ;;  %375 = vmatprep.subr.bf16.mxu1 %v516_v0  ;;  %v413_v12 = vld [vmem:[#allocation8 + $0x20] sm:$0xff]   ;;  %v408_v13 = vld [vmem:[#allocation6 + $0x38] sm:$0xff]   ;;  %v414_v14 = vld [vmem:[#allocation8 + $0x28] sm:$0xff]  }
  0x3b   :  { %v66_v15 = vld [vmem:[#allocation3] sm:$0xf]  ;;  %v415_v16 = vld [vmem:[#allocation8 + $0x30] sm:$0xff]  }
  0x3c   :  { %v416_v17 = vld [vmem:[#allocation8 + $0x38] sm:$0xff]  }
  0x3d   :  { %356 = vmatpush3.bf16.msra.mxu0 %v402_v2  ;;  %376 = vmatpush3.bf16.msra.mxu1 %v410_v6  ;;  %v317_v18 = vld [vmem:[%s611_s2] ss:$0 sm:$0xff]  ;;  %s483_s2 = scalar_lea.vmem %s308_s8, 128 }
  0x3e   :  { %357 = vmatprep.subr.bf16.mxu0 %v516_v0  ;;  %377 = vmatprep.subr.bf16.mxu1 %v516_v0  ;;  %v334_v26 = vld [vmem:[%s613_s4] ss:$0 sm:$0xff]  ;;  %p484_p10 = scmp.ne.s32.totalorder %s308_s8, %s483_s2  ;;  %p489_p12 = scmp.lt.s32.totalorder %s483_s2, %s483_s2 }
  0x40   :  { %p490_p13 = por %p489_p12, %p488_p11 }
  0x41   :  { %358 = vmatpush3.bf16.msra.mxu0 %v403_v3  ;;  %378 = vmatpush3.bf16.msra.mxu1 %v411_v8 }
  0x42   :  { %359 = vmatprep.subr.bf16.mxu0 %v516_v0  ;;  %379 = vmatprep.subr.bf16.mxu1 %v516_v0  ;;  %p491_p0 = pnand %p490_p13, %p484_p10 }
  0x45   :  { %360 = vmatpush3.bf16.msra.mxu0 %v404_v5  ;;  %380 = vmatpush3.bf16.msra.mxu1 %v412_v10 }
  0x46   :  { %361 = vmatprep.subr.bf16.mxu0 %v516_v0  ;;  %381 = vmatprep.subr.bf16.mxu1 %v516_v0 }
  0x49   :  { %362 = vmatpush3.bf16.msra.mxu0 %v405_v7  ;;  %382 = vmatpush3.bf16.msra.mxu1 %v413_v12 }
  0x4a   :  { %363 = vmatprep.subr.bf16.mxu0 %v516_v0  ;;  %383 = vmatprep.subr.bf16.mxu1 %v516_v0 }
  0x4d   :  { %364 = vmatpush3.bf16.msra.mxu0 %v406_v9  ;;  %384 = vmatpush3.bf16.msra.mxu1 %v414_v14 }
  0x4e   :  { %365 = vmatprep.subr.bf16.mxu0 %v516_v0  ;;  %385 = vmatprep.subr.bf16.mxu1 %v516_v0 }
  0x51   :  { %366 = vmatpush3.bf16.msra.mxu0 %v407_v11  ;;  %386 = vmatpush3.bf16.msra.mxu1 %v415_v16 }
  0x52   :  { %367 = vmatprep.subr.bf16.mxu0 %v516_v0  ;;  %387 = vmatprep.subr.bf16.mxu1 %v516_v0 }
  0x55   :  { %368 = vmatpush3.bf16.msra.mxu0 %v408_v13  ;;  %388 = vmatpush3.bf16.msra.mxu1 %v416_v17 }
  0x58   :  { %370 = vmatmul.mubr.bf16.vlgmr.msra.gmra.mrb[0].mxu0 %v66_v15 }
 0x12b   :  { %v172_v19 = vpop.f32.mrb[0].mxu0 }
 0x12c   :  { %v173_v20 = vadd.f32 %v317_v18, %v172_v19  ;;  %v371_v21 = vpop.f32.mrb[1].mxu0 }
 0x12d   :  { %v175_v22 = vpop.f32.mrb[2].mxu0 }
 0x12e   :  { %v178_v23 = vmax.f32 %v173_v20, 0.0  ;;  %v372_v24 = vpop.f32.mrb[3].mxu0 }
 0x130   :  { %v180_v25 = vpack.c.bf16 %v178_v23, %v178_v23 }
 0x132   :  { %390 = vmatmul.mubr.bf16.vlgmr.msra.gmra.mrb[0].mxu1 %v180_v25 }
 0x205   :  { %v279_v27 = vpop.f32.mrb[0].mxu1 }
 0x206   :  { %v298_v28 = vadd.f32 %v334_v26, %v279_v27  ;;  %v391_v29 = vpop.f32.mrb[1].mxu1 }
 0x207   :  { %v282_v30 = vpop.f32.mrb[2].mxu1 }
 0x208   :  { %v299_v31 = vmax.f32 %v298_v28, 0.0  ;;  %v392_v32 = vpop.f32.mrb[3].mxu1 }
 0x20a   :  { %300 = vst [vmem:[#allocation9] sm:$0xff] %v299_v31 }
 0x20b   :  { %494 = shalt.err (!%p491_p0)
}
 0x20c   :  { %s495_s4 = scalar_lea.hbm %s614_s5, 128 }
 0x20d   :  { %p496_p1 = scmp.ne.s32.totalorder %s614_s5, %s495_s4  ;;  %p499_p2 = scmp.lt.u32.totalorder %s495_s4, %s614_s5 }
 0x20f   :  { %p501_p3 = pnand %p499_p2, %p496_p1 }
 0x211   :  { %504 = shalt.err (!%p501_p3)
}
 0x212   :  { %310 = dma.vmem_to_hbm [thread:$0]  %s308_s8, 128, %s614_s5, [#allocation5]  }
 0x213   :  { %509 = dma.done.wait [#allocation5], 128  }
 0x214   :  { %510 = vsyncadd [#allocation5], 4294967168 }
 0x215   :  { %314 = vsyncpa [#allocation4], 1 }
 0x216   :  { %315 = vsyncpa [#allocation7], 1 }
 0x217   :  { %316 = vsyncpa [#allocation5], 1 }

</bundles_post_ra>
